<compile_context>
chip_gen: v5e
topology: v5e:2x2
jax: 0.10.0
libtpu: 0.0.40
codegen_flags: <defaults>
</compile_context>

<pallas_src>
import functools
import math

import jax
import jax.numpy as jnp
from jax import lax
from jax.experimental import pallas as pl
from jax.experimental.pallas import tpu as pltpu


def _num_tensorcores() -> int:
    """Best-effort TensorCores-per-chip detection (2 on v7x, else 1)."""
    try:
        kind = (getattr(jax.devices()[0], "device_kind", "") or "").lower()
        if "v7" in kind:
            return 2
    except Exception:
        pass
    return 1


def _round_up(a: int, m: int) -> int:
    return ((a + m - 1) // m) * m


def temporal_block_kernel(x_ref, w1_ref, b1_ref, w2_ref, b2_ref, wd_ref, bd_ref,
                          out_ref, *, K, dilation, T, has_downsample):
    """One batch-block per grid step.

    x_ref  : (1, C_in_p, BT)      f32   batch folded into the lane axis, BT % 128 == 0
    w1_ref : (C_out_p, K*C_in_p)  bf16  stacked weight-normalized conv1 weight
    w2_ref : (C_out_p, K*C_out_p) bf16  stacked weight-normalized conv2 weight
    b*_ref : (C_out_p, 1)         f32   biases
    wd_ref : (C_out_p, C_in_p)    f32   1x1 downsample weight (zeros if unused)
    out_ref: (1, C_out_p, BT)     f32
    """
    x = x_ref[0]                                       # (C_in_p, BT) f32
    BT = x.shape[1]

    # Hoisted once per grid step; shared by conv1 and conv2 (identical masks).
    tmod = lax.broadcasted_iota(jnp.int32, (1, BT), 1) % T
    shifts = [(K - 1 - k) * dilation for k in range(K)]          # tap k -> right shift
    masks = {s: (tmod >= s) for s in shifts if s > 0}            # (1, BT) bool each

    def causal_conv(a, w, b):
        """Causal dilated conv of a (C, BT) f32 slab -> (C_out_p, BT) f32 (bias added).

        Tap k is `a` rotated right by s=(K-1-k)*dilation via pltpu.roll; the
        tmod>=s mask zeroes both the circular wrap and any cross-segment
        (folded-batch) leakage, reproducing the conv pad=P + Chomp1d(P) result.
        """
        C = a.shape[0]
        taps = []
        for s in shifts:
            if s == 0:
                tap = a
            else:
                tap = jnp.where(masks[s], pltpu.roll(a, shift=s, axis=1), 0.0)
            taps.append(tap.astype(jnp.bfloat16))      # bf16 MXU operand, per tap
        if C < 128:
            # Tiny contraction dim: one stacked MXU dot over the bf16 im2col.
            acc = jnp.dot(w, jnp.concatenate(taps, axis=0),
                          preferred_element_type=jnp.float32)
        else:
            # Large channels: accumulate K per-tap dots; no (K*C, BT) slab in VMEM.
            acc = jnp.dot(w[:, 0:C], taps[0], preferred_element_type=jnp.float32)
            for k in range(1, K):
                acc = acc + jnp.dot(w[:, k * C:(k + 1) * C], taps[k],
                                    preferred_element_type=jnp.float32)
        return acc + b

    # ---- conv1 -> ReLU (dropout = identity at inference) ----
    h1 = jnp.maximum(causal_conv(x, w1_ref[...], b1_ref[...]), 0.0)
    # ---- conv2 -> ReLU; h1 stays in registers/VMEM ----
    h2 = jnp.maximum(causal_conv(h1, w2_ref[...], b2_ref[...]), 0.0)

    # ---- residual (1x1 conv downsample kept in f32 for parity) ----
    if has_downsample:
        res = jnp.dot(wd_ref[...], x, preferred_element_type=jnp.float32) + bd_ref[...]
    else:
        res = x

    out_ref[0] = jnp.maximum(h2 + res, 0.0).astype(out_ref.dtype)


def temporal_block(x, w1_oik, b1, w2_oik, b2, wd, bd, *, kernel_size, dilation, padding):
    """x: (B, C_in, T) f32.  w*_oik: PyTorch Conv1d layout (C_out, C_in, K), already
    weight-normalized.  wd/bd may be None when C_in == C_out."""
    B, C_in, T = x.shape
    K = kernel_size
    C_out = w1_oik.shape[0]
    assert padding == (K - 1) * dilation, "causal TCN convention (conv pad + Chomp1d)"
    has_downsample = wd is not None
    if not has_downsample:
        assert C_in == C_out

    # ---- chip-aware batch blocking: split only on multi-TC chips (v7x) ----
    n_blk = 1
    if _num_tensorcores() > 1 and B >= 2 and ((B + 1) // 2) * T >= 512:
        n_blk = 2

    # ---- sublane padding of channel counts ----
    C_in_p = _round_up(C_in, 8)
    C_out_p = _round_up(C_out, 8)

    # ---- lane padding: pad the batch so BT = B_blk*T is a multiple of 128 ----
    lane_unit = 128 // math.gcd(T, 128)
    B_blk = _round_up(max(1, -(-B // n_blk)), lane_unit)
    B_pad = n_blk * B_blk
    BT = B_blk * T

    xp = x.astype(jnp.float32)
    if B_pad != B or C_in_p != C_in:
        xp = jnp.pad(xp, ((0, B_pad - B), (0, C_in_p - C_in), (0, 0)))
    # (B_pad, C, T) -> (n_blk, C, B_blk*T): fold batch into lanes (layout plumbing).
    x_fold = (xp.reshape(n_blk, B_blk, C_in_p, T)
                .transpose(0, 2, 1, 3)
                .reshape(n_blk, C_in_p, BT))

    def pad_oik(w, o_p, i_p):
        O, I, _ = w.shape
        return jnp.pad(w, ((0, o_p - O), (0, i_p - I), (0, 0)))

    def stack(w):  # (O, I, K) -> (O, K*I) with w_s[o, k*I + i] = w[o, i, k]
        O, I, Kk = w.shape
        return jnp.transpose(w, (0, 2, 1)).reshape(O, Kk * I)

    # bf16 MXU operands for the convs (accumulation stays f32 inside the kernel).
    w1s = stack(pad_oik(w1_oik, C_out_p, C_in_p)).astype(jnp.bfloat16)
    w2s = stack(pad_oik(w2_oik, C_out_p, C_out_p)).astype(jnp.bfloat16)
    b1c = jnp.pad(b1, (0, C_out_p - C_out)).reshape(C_out_p, 1).astype(jnp.float32)
    b2c = jnp.pad(b2, (0, C_out_p - C_out)).reshape(C_out_p, 1).astype(jnp.float32)
    if has_downsample:
        wdp = jnp.pad(wd, ((0, C_out_p - C_out), (0, C_in_p - C_in))).astype(jnp.float32)
        bdp = jnp.pad(bd, (0, C_out_p - C_out)).reshape(C_out_p, 1).astype(jnp.float32)
    else:
        wdp = jnp.zeros((C_out_p, C_in_p), jnp.float32)
        bdp = jnp.zeros((C_out_p, 1), jnp.float32)

    kernel = functools.partial(temporal_block_kernel, K=K, dilation=dilation, T=T,
                               has_downsample=has_downsample)

    # NOTE: weights/biases have constant block indices; on v7x (64 MiB VMEM) they
    # could additionally be single-buffered (pl.Buffered(1)) to reclaim VMEM for
    # a larger BT tile.  At these sizes the default is fine.
    out_fold = pl.pallas_call(
        kernel,
        out_shape=jax.ShapeDtypeStruct((n_blk, C_out_p, BT), jnp.float32),
        grid_spec=pltpu.PrefetchScalarGridSpec(
            num_scalar_prefetch=0,
            grid=(n_blk,),
            in_specs=[
                pl.BlockSpec((1, C_in_p, BT), lambda i: (i, 0, 0)),
                pl.BlockSpec((C_out_p, K * C_in_p), lambda i: (0, 0)),
                pl.BlockSpec((C_out_p, 1), lambda i: (0, 0)),
                pl.BlockSpec((C_out_p, K * C_out_p), lambda i: (0, 0)),
                pl.BlockSpec((C_out_p, 1), lambda i: (0, 0)),
                pl.BlockSpec((C_out_p, C_in_p), lambda i: (0, 0)),
                pl.BlockSpec((C_out_p, 1), lambda i: (0, 0)),
            ],
            out_specs=pl.BlockSpec((1, C_out_p, BT), lambda i: (i, 0, 0)),
        ),
        compiler_params=pltpu.CompilerParams(
            dimension_semantics=("parallel",),
            vmem_limit_bytes=48 * 1024 * 1024),
    )(x_fold, w1s, b1c, w2s, b2c, wdp, bdp)

    # Unfold back to PyTorch layout (B, C_out, T) and drop padding.
    out = (out_fold.reshape(n_blk, C_out_p, B_blk, T)
                   .transpose(0, 2, 1, 3)
                   .reshape(B_pad, C_out_p, T))
    return out[:B, :C_out]


# ------------------------- parameter setup (plain JAX glue) -------------------------

def weight_norm_reparam(v, g):
    """PyTorch weight_norm (dim=0): W[o] = g[o] * V[o] / ||V[o]||_F."""
    norm = jnp.sqrt(jnp.sum(v.reshape(v.shape[0], -1) ** 2, axis=1))
    return (g / norm)[:, None, None] * v


def reference_forward(x, w1_oik, b1, w2_oik, b2, wd, bd, *, dilation, padding):
    """Independent pure-JAX reference (lax conv) mirroring the PyTorch forward."""
    def conv(inp, w, b):
        y = lax.conv_general_dilated(
            inp, w, window_strides=(1,), padding=[(padding, padding)],
            rhs_dilation=(dilation,), dimension_numbers=("NCH", "OIH", "NCH"))
        return y + b[None, :, None]

    h = conv(x, w1_oik, b1)[:, :, :-padding]          # Chomp1d
    h = jnp.maximum(h, 0.0)                           # ReLU (dropout = identity, eval)
    h = conv(h, w2_oik, b2)[:, :, :-padding]
    h = jnp.maximum(h, 0.0)
    res = jnp.einsum("oi,bit->bot", wd, x) + bd[None, :, None]
    return jnp.maximum(h + res, 0.0)


if __name__ == "__main__":
    # Module config: TemporalBlock(n_inputs=4, n_outputs=8, kernel_size=3, stride=1,
    #                              dilation=2, padding=(3-1)*2=4)
    n_inputs, n_outputs = 4, 8
    kernel_size, stride, dilation = 3, 1, 2
    padding = (kernel_size - 1) * dilation
    B, T = 2, 16

    key = jax.random.PRNGKey(0)
    k1, k2, k3, k4, k5, k6, kx = jax.random.split(key, 7)

    # Deterministic synthetic parameters (shapes from __init__).
    v1 = 0.01 * jax.random.normal(k1, (n_outputs, n_inputs, kernel_size), jnp.float32)
    g1 = 0.5 + 0.05 * jnp.arange(n_outputs, dtype=jnp.float32)
    w1_oik = weight_norm_reparam(v1, g1)
    b1 = 0.01 * jax.random.normal(k2, (n_outputs,), jnp.float32)

    v2 = 0.01 * jax.random.normal(k3, (n_outputs, n_outputs, kernel_size), jnp.float32)
    g2 = 0.5 + 0.03 * jnp.arange(n_outputs, dtype=jnp.float32)
    w2_oik = weight_norm_reparam(v2, g2)
    b2 = 0.01 * jax.random.normal(k4, (n_outputs,), jnp.float32)

    wd = 0.01 * jax.random.normal(k5, (n_outputs, n_inputs), jnp.float32)  # 1x1 conv
    bd = 0.01 * jax.random.normal(k6, (n_outputs,), jnp.float32)

    x = jax.random.normal(kx, (B, n_inputs, T), jnp.float32)

    out = temporal_block(x, w1_oik, b1, w2_oik, b2, wd, bd,
                         kernel_size=kernel_size, dilation=dilation, padding=padding)
    out = jax.block_until_ready(out)

    ref = reference_forward(x, w1_oik, b1, w2_oik, b2, wd, bd,
                            dilation=dilation, padding=padding)
    assert out.shape == (B, n_outputs, T)
    # bf16 MXU conv operands (f32 accumulation) => slightly loosened tolerance.
    assert jnp.allclose(out, ref, rtol=5e-2, atol=5e-2), "mismatch vs reference"

    print("KERNEL_OK")
</pallas_src>

<mosaic_0001>
module attributes {stable_mosaic.version = 11 : i64} {
  func.func @temporal_block_kernel(%arg0: i32, %arg1: memref<1x8x128xf32, #tpu.memory_space<vmem>>, %arg2: memref<8x24xbf16, #tpu.memory_space<vmem>>, %arg3: memref<8x1xf32, #tpu.memory_space<vmem>>, %arg4: memref<8x24xbf16, #tpu.memory_space<vmem>>, %arg5: memref<8x1xf32, #tpu.memory_space<vmem>>, %arg6: memref<8x8xf32, #tpu.memory_space<vmem>>, %arg7: memref<8x1xf32, #tpu.memory_space<vmem>>, %arg8: memref<1x8x128xf32, #tpu.memory_space<vmem>>) attributes {dimension_semantics = [#tpu.dimension_semantics<parallel>], iteration_bounds = array<i64: 1>, scalar_prefetch = 0 : i64, scratch_operands = 0 : i64, tpu.core_type = #tpu.core_type<tc>, window_params = [{transform_indices = @transform_0, window_bounds = array<i64: 1, 8, 128>}, {pipeline_mode = #tpu.pipeline_mode<synchronous>, transform_indices = @transform_1, window_bounds = array<i64: 8, 24>}, {pipeline_mode = #tpu.pipeline_mode<synchronous>, transform_indices = @transform_2, window_bounds = array<i64: 8, 1>}, {pipeline_mode = #tpu.pipeline_mode<synchronous>, transform_indices = @transform_3, window_bounds = array<i64: 8, 24>}, {pipeline_mode = #tpu.pipeline_mode<synchronous>, transform_indices = @transform_4, window_bounds = array<i64: 8, 1>}, {pipeline_mode = #tpu.pipeline_mode<synchronous>, transform_indices = @transform_5, window_bounds = array<i64: 8, 8>}, {pipeline_mode = #tpu.pipeline_mode<synchronous>, transform_indices = @transform_6, window_bounds = array<i64: 8, 1>}, {transform_indices = @transform_7, window_bounds = array<i64: 1, 8, 128>}]} {
    %c0 = arith.constant 0 : index
    %c0_0 = arith.constant 0 : index
    %c0_1 = arith.constant 0 : index
    %0 = vector.load %arg1[%c0, %c0_0, %c0_1] : memref<1x8x128xf32, #tpu.memory_space<vmem>>, vector<1x8x128xf32>
    %1 = vector.shape_cast %0 : vector<1x8x128xf32> to vector<8x128xf32>
    %2 = tpu.iota {dimensions = array<i32: 1>} : vector<1x128xi32>
    %c16_i32 = arith.constant 16 : i32
    %c0_i32 = arith.constant 0 : i32
    %3 = arith.cmpi eq, %c16_i32, %c0_i32 : i32
    %c1_i32 = arith.constant 1 : i32
    %4 = arith.select %3, %c1_i32, %c16_i32 : i32
    %5 = vector.broadcast %4 : i32 to vector<1x128xi32>
    %6 = arith.remsi %2, %5 : vector<1x128xi32>
    %c0_i32_2 = arith.constant 0 : i32
    %7 = vector.broadcast %c0_i32_2 : i32 to vector<1x128xi32>
    %8 = arith.cmpi ne, %6, %7 : vector<1x128xi32>
    %c0_i32_3 = arith.constant 0 : i32
    %9 = vector.broadcast %c0_i32_3 : i32 to vector<1x128xi32>
    %10 = arith.cmpi slt, %6, %9 : vector<1x128xi32>
    %c0_i32_4 = arith.constant 0 : i32
    %11 = arith.cmpi slt, %4, %c0_i32_4 : i32
    %12 = vector.broadcast %11 : i1 to vector<1x128xi1>
    %13 = vector.broadcast %12 : vector<1x128xi1> to vector<1x128xi1>
    %14 = arith.xori %10, %13 : vector<1x128xi1>
    %15 = arith.andi %14, %8 : vector<1x128xi1>
    %16 = vector.broadcast %4 : i32 to vector<1x128xi32>
    %17 = arith.addi %6, %16 : vector<1x128xi32>
    %18 = arith.select %15, %17, %6 : vector<1x128xi1>, vector<1x128xi32>
    %c4_i32 = arith.constant 4 : i32
    %19 = vector.broadcast %c4_i32 : i32 to vector<1x128xi32>
    %20 = arith.cmpi sge, %18, %19 : vector<1x128xi32>
    %c2_i32 = arith.constant 2 : i32
    %21 = vector.broadcast %c2_i32 : i32 to vector<1x128xi32>
    %22 = arith.cmpi sge, %18, %21 : vector<1x128xi32>
    %c0_5 = arith.constant 0 : index
    %c0_6 = arith.constant 0 : index
    %23 = vector.load %arg2[%c0_5, %c0_6] : memref<8x24xbf16, #tpu.memory_space<vmem>>, vector<8x24xbf16>
    %c0_7 = arith.constant 0 : index
    %c0_8 = arith.constant 0 : index
    %24 = vector.load %arg3[%c0_7, %c0_8] : memref<8x1xf32, #tpu.memory_space<vmem>>, vector<8x1xf32>
    %c4_i32_9 = arith.constant 4 : i32
    %25 = tpu.dynamic_rotate %1 by %c4_i32_9 dim 1 : vector<8x128xf32>, i32 -> vector<8x128xf32>
    %cst = arith.constant 0.000000e+00 : f32
    %26 = vector.shape_cast %20 : vector<1x128xi1> to vector<1x128xi1>
    %27 = vector.broadcast %26 : vector<1x128xi1> to vector<8x128xi1>
    %28 = vector.broadcast %cst : f32 to vector<8x128xf32>
    %29 = arith.select %27, %25, %28 : vector<8x128xi1>, vector<8x128xf32>
    %30 = arith.truncf %29 : vector<8x128xf32> to vector<8x128xbf16>
    %c2_i32_10 = arith.constant 2 : i32
    %31 = tpu.dynamic_rotate %1 by %c2_i32_10 dim 1 : vector<8x128xf32>, i32 -> vector<8x128xf32>
    %cst_11 = arith.constant 0.000000e+00 : f32
    %32 = vector.shape_cast %22 : vector<1x128xi1> to vector<1x128xi1>
    %33 = vector.broadcast %32 : vector<1x128xi1> to vector<8x128xi1>
    %34 = vector.broadcast %cst_11 : f32 to vector<8x128xf32>
    %35 = arith.select %33, %31, %34 : vector<8x128xi1>, vector<8x128xf32>
    %36 = arith.truncf %35 : vector<8x128xf32> to vector<8x128xbf16>
    %37 = arith.truncf %1 : vector<8x128xf32> to vector<8x128xbf16>
    %38 = tpu.concatenate %30, %36, %37 in 0 : vector<8x128xbf16>, vector<8x128xbf16>, vector<8x128xbf16> -> vector<24x128xbf16>
    %cst_12 = arith.constant dense<0.000000e+00> : vector<8x128xf32>
    %39 = tpu.matmul %23, %38, %cst_12 {dimension_numbers = #tpu.dot_dimension_numbers<[1], [0], [0], [1], [0, 0, 1, 1], [], []>} : vector<8x24xbf16>, vector<24x128xbf16>, vector<8x128xf32> -> vector<8x128xf32>
    %40 = vector.broadcast %24 : vector<8x1xf32> to vector<8x128xf32>
    %41 = arith.addf %39, %40 : vector<8x128xf32>
    %cst_13 = arith.constant 0.000000e+00 : f32
    %42 = vector.broadcast %cst_13 : f32 to vector<8x128xf32>
    %43 = arith.maximumf %41, %42 : vector<8x128xf32>
    %c0_14 = arith.constant 0 : index
    %c0_15 = arith.constant 0 : index
    %44 = vector.load %arg4[%c0_14, %c0_15] : memref<8x24xbf16, #tpu.memory_space<vmem>>, vector<8x24xbf16>
    %c0_16 = arith.constant 0 : index
    %c0_17 = arith.constant 0 : index
    %45 = vector.load %arg5[%c0_16, %c0_17] : memref<8x1xf32, #tpu.memory_space<vmem>>, vector<8x1xf32>
    %c4_i32_18 = arith.constant 4 : i32
    %46 = tpu.dynamic_rotate %43 by %c4_i32_18 dim 1 : vector<8x128xf32>, i32 -> vector<8x128xf32>
    %cst_19 = arith.constant 0.000000e+00 : f32
    %47 = vector.shape_cast %20 : vector<1x128xi1> to vector<1x128xi1>
    %48 = vector.broadcast %47 : vector<1x128xi1> to vector<8x128xi1>
    %49 = vector.broadcast %cst_19 : f32 to vector<8x128xf32>
    %50 = arith.select %48, %46, %49 : vector<8x128xi1>, vector<8x128xf32>
    %51 = arith.truncf %50 : vector<8x128xf32> to vector<8x128xbf16>
    %c2_i32_20 = arith.constant 2 : i32
    %52 = tpu.dynamic_rotate %43 by %c2_i32_20 dim 1 : vector<8x128xf32>, i32 -> vector<8x128xf32>
    %cst_21 = arith.constant 0.000000e+00 : f32
    %53 = vector.shape_cast %22 : vector<1x128xi1> to vector<1x128xi1>
    %54 = vector.broadcast %53 : vector<1x128xi1> to vector<8x128xi1>
    %55 = vector.broadcast %cst_21 : f32 to vector<8x128xf32>
    %56 = arith.select %54, %52, %55 : vector<8x128xi1>, vector<8x128xf32>
    %57 = arith.truncf %56 : vector<8x128xf32> to vector<8x128xbf16>
    %58 = arith.truncf %43 : vector<8x128xf32> to vector<8x128xbf16>
    %59 = tpu.concatenate %51, %57, %58 in 0 : vector<8x128xbf16>, vector<8x128xbf16>, vector<8x128xbf16> -> vector<24x128xbf16>
    %cst_22 = arith.constant dense<0.000000e+00> : vector<8x128xf32>
    %60 = tpu.matmul %44, %59, %cst_22 {dimension_numbers = #tpu.dot_dimension_numbers<[1], [0], [0], [1], [0, 0, 1, 1], [], []>} : vector<8x24xbf16>, vector<24x128xbf16>, vector<8x128xf32> -> vector<8x128xf32>
    %61 = vector.broadcast %45 : vector<8x1xf32> to vector<8x128xf32>
    %62 = arith.addf %60, %61 : vector<8x128xf32>
    %cst_23 = arith.constant 0.000000e+00 : f32
    %63 = vector.broadcast %cst_23 : f32 to vector<8x128xf32>
    %64 = arith.maximumf %62, %63 : vector<8x128xf32>
    %c0_24 = arith.constant 0 : index
    %c0_25 = arith.constant 0 : index
    %65 = vector.load %arg6[%c0_24, %c0_25] : memref<8x8xf32, #tpu.memory_space<vmem>>, vector<8x8xf32>
    %cst_26 = arith.constant dense<0.000000e+00> : vector<8x128xf32>
    %66 = tpu.matmul %65, %1, %cst_26 {dimension_numbers = #tpu.dot_dimension_numbers<[1], [0], [0], [1], [0, 0, 1, 1], [], []>} : vector<8x8xf32>, vector<8x128xf32>, vector<8x128xf32> -> vector<8x128xf32>
    %c0_27 = arith.constant 0 : index
    %c0_28 = arith.constant 0 : index
    %67 = vector.load %arg7[%c0_27, %c0_28] : memref<8x1xf32, #tpu.memory_space<vmem>>, vector<8x1xf32>
    %68 = vector.broadcast %67 : vector<8x1xf32> to vector<8x128xf32>
    %69 = arith.addf %66, %68 : vector<8x128xf32>
    %70 = arith.addf %64, %69 : vector<8x128xf32>
    %cst_29 = arith.constant 0.000000e+00 : f32
    %71 = vector.broadcast %cst_29 : f32 to vector<8x128xf32>
    %72 = arith.maximumf %70, %71 : vector<8x128xf32>
    %c0_30 = arith.constant 0 : index
    %c0_31 = arith.constant 0 : index
    %c0_32 = arith.constant 0 : index
    %73 = vector.load %arg8[%c0_30, %c0_31, %c0_32] : memref<1x8x128xf32, #tpu.memory_space<vmem>>, vector<1x8x128xf32>
    %74 = vector.shape_cast %73 : vector<1x8x128xf32> to vector<8x128xf32>
    %75 = vector.shape_cast %72 : vector<8x128xf32> to vector<1x8x128xf32>
    tpu.vector_store %arg8[%c0_30, %c0_31, %c0_32], %75 {strides = array<i32>} : memref<1x8x128xf32, #tpu.memory_space<vmem>>, vector<1x8x128xf32>,
    return
  }
  func.func @transform_0(%arg0: i32) -> (i32, i32, i32) {
    %c0_i32 = arith.constant 0 : i32
    %c0_i32_0 = arith.constant 0 : i32
    %c0_i32_1 = arith.constant 0 : i32
    return %arg0, %c0_i32, %c0_i32_0 : i32, i32, i32
  }
  func.func @transform_1(%arg0: i32) -> (i32, i32) {
    %c0_i32 = arith.constant 0 : i32
    %c0_i32_0 = arith.constant 0 : i32
    %c0_i32_1 = arith.constant 0 : i32
    return %c0_i32, %c0_i32_0 : i32, i32
  }
  func.func @transform_2(%arg0: i32) -> (i32, i32) {
    %c0_i32 = arith.constant 0 : i32
    %c0_i32_0 = arith.constant 0 : i32
    %c0_i32_1 = arith.constant 0 : i32
    return %c0_i32, %c0_i32_0 : i32, i32
  }
  func.func @transform_3(%arg0: i32) -> (i32, i32) {
    %c0_i32 = arith.constant 0 : i32
    %c0_i32_0 = arith.constant 0 : i32
    %c0_i32_1 = arith.constant 0 : i32
    return %c0_i32, %c0_i32_0 : i32, i32
  }
  func.func @transform_4(%arg0: i32) -> (i32, i32) {
    %c0_i32 = arith.constant 0 : i32
    %c0_i32_0 = arith.constant 0 : i32
    %c0_i32_1 = arith.constant 0 : i32
    return %c0_i32, %c0_i32_0 : i32, i32
  }
  func.func @transform_5(%arg0: i32) -> (i32, i32) {
    %c0_i32 = arith.constant 0 : i32
    %c0_i32_0 = arith.constant 0 : i32
    %c0_i32_1 = arith.constant 0 : i32
    return %c0_i32, %c0_i32_0 : i32, i32
  }
  func.func @transform_6(%arg0: i32) -> (i32, i32) {
    %c0_i32 = arith.constant 0 : i32
    %c0_i32_0 = arith.constant 0 : i32
    %c0_i32_1 = arith.constant 0 : i32
    return %c0_i32, %c0_i32_0 : i32, i32
  }
  func.func @transform_7(%arg0: i32) -> (i32, i32, i32) {
    %c0_i32 = arith.constant 0 : i32
    %c0_i32_0 = arith.constant 0 : i32
    %c0_i32_1 = arith.constant 0 : i32
    return %arg0, %c0_i32, %c0_i32_0 : i32, i32, i32
  }
}

</mosaic_0001>

<bundles_post_ra>
// kernel: tpu_custom_call.1
= control target key start
LH: loop header
LB: loop body
LE: loop exit
PB: predicated region body
PF: predicated region fallthrough
CT: control target
= control target key end

     0   :  { %s317_s0 = inlined_call_operand.vmem [shape: f32[1,8,128], index: 0, kind: input, shape index: {}]   ;;  %s318_s1 = inlined_call_operand.vmem [shape: bf16[8,24], index: 1, kind: input, shape index: {}]   ;;  %s319_s2 = inlined_call_operand.vmem [shape: f32[8,1], index: 2, kind: input, shape index: {}]   ;;  %s320_s3 = inlined_call_operand.vmem [shape: bf16[8,24], index: 3, kind: input, shape index: {}]   ;;  %s321_s4 = inlined_call_operand.vmem [shape: f32[8,1], index: 4, kind: input, shape index: {}]   ;;  %s322_s5 = inlined_call_operand.vmem [shape: f32[8,8], index: 5, kind: input, shape index: {}]   ;;  %s323_s6 = inlined_call_operand.vmem [shape: f32[8,1], index: 6, kind: input, shape index: {}]   ;;  %s324_s7 = inlined_call_operand.hbm [shape: f32[1,8,128], index: 7, kind: output, shape index: {}]  }
   0x1   :  { %v28_v0 = vld [vmem:[%s317_s0] sm:$0xff] }
   0x2   :  { %12 = vsyncpa [#allocation3], 0  ;;  %s223_s26 = smov 2   ;;  %163 = vmatpush.msra.mxu2 %v28_v0  ;;  %s224_s27 = smov 4   ;;  %v59_v1 = vpack.c.bf16 %v28_v0, %v28_v0  ;;  %vm63_vm0 = vcmask 1043456   ;;  %v46_v3 = vld [vmem:[%s319_s2] sm:$0xff]  ;;  %v29_v5 = vlaneseq }
   0x3   :  { %53 = vrot.lane.b32.xlu0 %v28_v0, %s223_s26  ;;  %v225_v4 = vmov 0   ;;  %v45_v19 = vld [vmem:[%s318_s1] sm:$0xf]  ;;  %vm73_vm3 = vcmask 195584   ;;  %vm144_vm4 = vcmask 64512   ;;  %s178_s15 = sshll.u32 %s324_s7, 4  ;;  %s179_s15 = int_to_ptr.hbm [resolvable:$true] %s178_s15 }
   0x4   :  { %v78_v2 = vsel %vm63_vm0, %v59_v1, 0  ;;  %194 = vset.pattern.permute.xlu1 %v225_v4  ;;  %196 = vset.pattern.permute.xlu0 %v225_v4  ;;  %v30_v6 = vand.u32 127, %v29_v5  ;;  %v137_v27 = vld [vmem:[%s322_s5] sm:$0xff] }
   0x5   :  { %86 = vmatpush.bf16.msra.mxu0 %v78_v2  ;;  %70 = vperm.xlu1 %194, %v46_v3   ;;  %v138_v28 = vld [vmem:[%s323_s6] sm:$0xff] }
   0x6   :  { %195 = vset.pattern.permute.xlu2 %v225_v4  ;;  %v35_v7 = vand.u32 15, %v30_v6  ;;  %189 = vmatmul.msk.f32.vlgmr.msra.gmra.mxu2 %vm144_vm4, %v137_v27  ;;  %v95_v29 = vld [vmem:[%s321_s4] sm:$0xff]  ;;  %s226_s4 = smov [#allocation2]  }
   0x7   :  { %v94_v39 = vld [vmem:[%s320_s3] sm:$0xf]  ;;  %s176_s12 = sshll.u32 %s226_s4, 4  ;;  %s177_s12 = int_to_ptr.vmem [resolvable:$true] %s176_s12 }
   0x8   :  { %vm276_vm1 = vcmp.ge.s32.totalorder %v35_v7, 2  ;;  %vm282_vm2 = vcmp.ge.s32.totalorder %v35_v7, 4 }
   0xb   :  { %47 = vrot.lane.b32.xlu0 %v28_v0, %s224_s27 }
  0x13   :  { %141 = vperm.xlu0 %196, %v138_v28  }
  0x75   :  { %v54_v9 = vpop.permute.xlu0 %53 }
  0x76   :  { %v57_v10 = vsel %vm276_vm1, %v54_v9, 0.0 }
  0x77   :  { %v58_v11 = vpack.c.bf16 %v57_v10, %v57_v10  ;;  %v71_v20 = vpop.permute.xlu1 %70 }
  0x79   :  { %v61_v12 = vunpack.c.l.b16 %v58_v11 }
  0x7b   :  { %v62_v16 = vpack.c.b16 %v61_v12, %v61_v12 }
  0x7d   :  { %v48_v14 = vpop.permute.xlu0 %47 }
  0x7e   :  { %v51_v15 = vsel %vm282_vm2, %v48_v14, 0.0 }
  0x7f   :  { %v52_v17 = vpack.c.bf16 %v51_v15, %v51_v15 }
  0x81   :  { %v66_v18 = vsel %vm63_vm0, %v52_v17, %v62_v16 }
  0x82   :  { %87 = vmatpush.bf16.msra.mxu0 %v66_v18 }
  0x85   :  { %187 = vmatmul.msk.bf16.vlgmr.msra.gmra.mxu0 %vm73_vm3, %v45_v19  ;;  %v142_v41 = vpop.permute.xlu0 %141 }
  0x89   :  { %v165_v42 = vpop.f32.mrf.mxu2 }
  0x8a   :  { %v166_v45 = vadd.f32 %v165_v42, %v142_v41 }
 0x102   :  { %v89_v21 = vpop.f32.mrf.mxu0 }
 0x103   :  { %v90_v22 = vadd.f32 %v89_v21, %v71_v20 }
 0x105   :  { %v93_v23 = vmax.f32 %v90_v22, 0.0 }
 0x107   :  { %96 = vrot.lane.b32.xlu2 %v93_v23, %s224_s27  ;;  %100 = vrot.lane.b32.xlu1 %v93_v23, %s223_s26  ;;  %v104_v24 = vpack.c.bf16 %v93_v23, %v93_v23 }
 0x109   :  { %v121_v25 = vsel %vm63_vm0, %v104_v24, 0 }
 0x10a   :  { %v91_v26 = vpop.f32.mrf.mxu0  ;;  %129 = vmatpush.bf16.msra.mxu1 %v121_v25 }
 0x10f   :  { %114 = vperm.xlu2 %195, %v95_v29  }
 0x161   :  { %v97_v30 = vpop.permute.xlu2 %96 }
 0x162   :  { %v98_v34 = vsel %vm282_vm2, %v97_v30, 0.0 }
 0x163   :  { %v99_v36 = vpack.c.bf16 %v98_v34, %v98_v34 }
 0x169   :  { %v115_v40 = vpop.permute.xlu2 %114 }
 0x179   :  { %v101_v31 = vpop.permute.xlu1 %100 }
 0x17a   :  { %v102_v32 = vsel %vm276_vm1, %v101_v31, 0.0 }
 0x17b   :  { %v103_v33 = vpack.c.bf16 %v102_v32, %v102_v32 }
 0x17d   :  { %v106_v35 = vunpack.c.l.b16 %v103_v33 }
 0x17f   :  { %v107_v37 = vpack.c.b16 %v106_v35, %v106_v35 }
 0x181   :  { %v110_v38 = vsel %vm63_vm0, %v99_v36, %v107_v37 }
 0x182   :  { %130 = vmatpush.bf16.msra.mxu1 %v110_v38 }
 0x185   :  { %188 = vmatmul.msk.bf16.vlgmr.msra.gmra.mxu1 %vm73_vm3, %v94_v39 }
 0x202   :  { %v132_v43 = vpop.f32.mrf.mxu1 }
 0x203   :  { %v133_v44 = vadd.f32 %v132_v43, %v115_v40 }
 0x205   :  { %v136_v46 = vmax.f32 %v133_v44, 0.0 }
 0x207   :  { %v168_v47 = vadd.f32 %v166_v45, %v136_v46 }
 0x209   :  { %v169_v48 = vmax.f32 %v168_v47, 0.0 }
 0x20a   :  { %v134_v49 = vpop.f32.mrf.mxu1 }
 0x20b   :  { %170 = vst [vmem:[#allocation2] sm:$0xff] %v169_v48 }
 0x20c   :  { %181 = dma.vmem_to_hbm [thread:$0]  %s177_s12, 128, %s179_s15, [#allocation3]  }
 0x20d   :  { %221 = dma.done.wait [#allocation3], 128  }
 0x20e   :  { %222 = vsyncadd [#allocation3], 4294967168 }
 0x20f   :  { %186 = vsyncpa [#allocation3], 1 }

</bundles_post_ra>
